<compile_context>
chip_gen: v5e
topology: v5e:2x2
jax: 0.10.0
libtpu: 0.0.40
codegen_flags: <defaults>
</compile_context>

<pallas_src>
import math
import functools
from functools import partial

import numpy as np
import jax
import jax.numpy as jnp
from jax.experimental import pallas as pl
from jax.experimental.pallas import tpu as pltpu


# -----------------------------------------------------------------------------
# small helpers
# -----------------------------------------------------------------------------
def _round_up(x, m):
    return ((x + m - 1) // m) * m


@functools.lru_cache(maxsize=None)
def _vmem_cap_bytes():
    # generation-aware VMEM capacity (128 MiB on v5e/v6e, 64 MiB on v7x);
    # conservative fallback if the query is unavailable.
    try:
        return int(pltpu.get_tpu_info().vmem_capacity_bytes)
    except Exception:
        return 64 << 20


def _to_uint8(x):
    # emulates .clamp(0, 255).to(torch.uint8) (truncation; values >= 0 after clip)
    return jnp.floor(jnp.clip(x, 0.0, 255.0))


def _blend(img1, img2, ratio):
    return _to_uint8(ratio * img1 + (1.0 - ratio) * img2)


def _gray(x):
    # x: (C, H, W) float32 -> (1, H, W); emulates uint8 truncation of rgb_to_grayscale
    if x.shape[0] < 3:
        return x[0:1]
    return jnp.floor(0.2989 * x[0:1] + 0.587 * x[1:2] + 0.114 * x[2:3])


# -----------------------------------------------------------------------------
# per-op elementwise transforms on a (C, H, W) float32 block (uint8 semantics)
# -----------------------------------------------------------------------------
def _op_brightness(x, p):
    return _blend(x, jnp.zeros_like(x), p)


def _op_color(x, p):
    return _blend(x, jnp.broadcast_to(_gray(x), x.shape), p)


def _op_contrast(x, p):
    g = _gray(x) if x.shape[0] >= 3 else x
    mean = jnp.mean(g, keepdims=True)            # (1, 1, 1) scalar mean of grayscale
    return _blend(x, mean, p)


def _op_sharpness(x, p):
    # 3x3 blur ([[1,1,1],[1,5,1],[1,1,1]]/13) as two small band-matrix matmuls on
    # the MXU (separable box filter); border ring keeps the original pixels.
    C, H, W = x.shape
    ih = jax.lax.broadcasted_iota(jnp.int32, (H, H), 0)
    jh = jax.lax.broadcasted_iota(jnp.int32, (H, H), 1)
    band_h = jnp.broadcast_to(
        (jnp.abs(ih - jh) <= 1).astype(jnp.float32)[None], (C, H, H))
    iw = jax.lax.broadcasted_iota(jnp.int32, (W, W), 0)
    jw = jax.lax.broadcasted_iota(jnp.int32, (W, W), 1)
    band_w = jnp.broadcast_to(
        (jnp.abs(iw - jw) <= 1).astype(jnp.float32)[None], (C, W, W))
    horiz = jnp.einsum('chw,cvw->chv', x, band_w,
                       preferred_element_type=jnp.float32)      # sum over w-1..w+1
    box3 = jnp.einsum('cgh,chv->cgv', band_h, horiz,
                      preferred_element_type=jnp.float32)       # sum over h-1..h+1
    s = (box3 + 4.0 * x) / 13.0                                  # 8 neighbours + 5*center
    blurred = jnp.round(s)
    hh = jax.lax.broadcasted_iota(jnp.int32, (1, H, W), 1)
    ww = jax.lax.broadcasted_iota(jnp.int32, (1, H, W), 2)
    border = (hh == 0) | (hh == H - 1) | (ww == 0) | (ww == W - 1)
    blurred = jnp.where(border, x, blurred)                      # torchvision border handling
    return _blend(x, blurred, p)


def _op_posterize(x, p):
    inv = 1.0 / p                                                # p is an exact power of two
    return jnp.floor(x * inv) * p


def _op_solarize(x, p):
    return jnp.where(x >= p, 255.0 - x, x)


def _op_autocontrast(x, p):
    mn = jnp.min(x, axis=(1, 2), keepdims=True)
    mx = jnp.max(x, axis=(1, 2), keepdims=True)
    eq = mx == mn
    scale = jnp.where(eq, 1.0, 255.0 / jnp.where(eq, 1.0, mx - mn))
    minimum = jnp.where(eq, 0.0, mn)
    return _to_uint8((x - minimum) * scale)


def _op_grayscale(x, p):
    return jnp.broadcast_to(_gray(x), x.shape)


_EW_FNS = {
    'brightness': _op_brightness,
    'color': _op_color,
    'contrast': _op_contrast,
    'sharpness': _op_sharpness,
    'posterize': _op_posterize,
    'solarize': _op_solarize,
    'autocontrast': _op_autocontrast,
    'grayscale': _op_grayscale,
}

_EW_OPS = {'Brightness', 'Color', 'Contrast', 'Sharpness',
           'Posterize', 'Solarize', 'AutoContrast', 'Grayscale'}


def _ew_entry(op_name, magnitude, C, H, W):
    """Map a RandAugment op to (kernel op key, runtime param); None if a no-op here."""
    if op_name == 'Brightness':
        return ('brightness', 1.0 + magnitude)
    if op_name == 'Color':
        return ('color', 1.0 + magnitude) if C >= 3 else None
    if op_name == 'Contrast':
        return ('contrast', 1.0 + magnitude)
    if op_name == 'Sharpness':
        return ('sharpness', 1.0 + magnitude) if (H > 2 and W > 2) else None
    if op_name == 'Posterize':
        return ('posterize', float(2 ** (8 - int(magnitude))))
    if op_name == 'Solarize':
        return ('solarize', float(magnitude))
    if op_name == 'AutoContrast':
        return ('autocontrast', 0.0)
    if op_name == 'Grayscale':
        return ('grayscale', 0.0) if C >= 3 else None
    raise KeyError(op_name)


# -----------------------------------------------------------------------------
# fused elementwise-chain Pallas kernel: (C, H, W) bf16 block, params in SMEM
# -----------------------------------------------------------------------------
def _ew_vmem_limit(C, H, W):
    need = 4 * (C * H * W * 2) + 12 * (C * H * W * 4) + (8 << 20)
    return int(min(max(need, 32 << 20), _vmem_cap_bytes() * 7 // 10))


@functools.lru_cache(maxsize=None)
def _build_chain_call(ops, N, C, H, W):
    def kernel(p_ref, x_ref, o_ref):
        x = x_ref[...].astype(jnp.float32)          # (C, H, W), integer-valued
        for i, op in enumerate(ops):
            x = _EW_FNS[op](x, p_ref[i])
        o_ref[...] = x.astype(o_ref.dtype)

    fn = pl.pallas_call(
        kernel,
        out_shape=jax.ShapeDtypeStruct((N, C, H, W), jnp.bfloat16),
        grid=(N,),
        in_specs=[pl.BlockSpec(memory_space=pltpu.MemorySpace.SMEM),
                  pl.BlockSpec((None, C, H, W), lambda n: (n, 0, 0, 0))],
        out_specs=pl.BlockSpec((None, C, H, W), lambda n: (n, 0, 0, 0)),
        compiler_params=pltpu.CompilerParams(
            dimension_semantics=("parallel",),
            vmem_limit_bytes=_ew_vmem_limit(C, H, W)),
    )
    return jax.jit(fn)


def _apply_ew_chain(img, entries):
    """img: (N, C, H, W) bf16; entries: tuple of (op_key, param)."""
    if not entries:
        return img
    N, C, H, W = img.shape
    ops = tuple(k for k, _ in entries)
    params = jnp.asarray([p for _, p in entries], dtype=jnp.float32)
    return _build_chain_call(ops, N, C, H, W)(params, img)


# -----------------------------------------------------------------------------
# geometric ops: nearest-neighbour gather = batched one-hot bf16 matmul on MXU
#   LHS (N*C, HW_in) bf16, reduction chunked over a trailing grid axis.
# -----------------------------------------------------------------------------
def _gather_kernel(src_ref, x_ref, o_ref, acc_ref, *, tk, fill):
    k = pl.program_id(1)

    @pl.when(k == 0)
    def _():
        acc_ref[...] = jnp.zeros_like(acc_ref)

    src = src_ref[...]                                            # (1, T) int32, -1 == fill
    kk = jax.lax.broadcasted_iota(jnp.int32, (tk, 1), 0) + k * tk
    onehot = (kk == src).astype(jnp.bfloat16)                     # (tk, T)
    acc_ref[...] += jnp.dot(x_ref[...], onehot,
                            preferred_element_type=jnp.float32)   # (NC, T) on the MXU

    @pl.when(k == pl.num_programs(1) - 1)
    def _():
        o_ref[...] = jnp.where(src >= 0, acc_ref[...], fill).astype(o_ref.dtype)


def _choose_gather_tiles(HW):
    hw128 = _round_up(HW, 128)
    tile_n = min(1024, hw128)
    for cand in (1024, 768, 512, 384, 256, 128):                  # prefer a divisor of HW
        if cand <= hw128 and HW % cand == 0:
            tile_n = cand
            break
    max_onehot_elems = (4 << 20) // 2                             # ~4 MiB bf16 one-hot chunk
    tk = max(128, min(_round_up(HW, 128),
                      (max_onehot_elems // tile_n) // 128 * 128,
                      2048))
    return tile_n, tk


def _gather_vmem_limit(NC, tile_n, tk):
    need = tk * tile_n * 8 + NC * tk * 2 * 4 + NC * tile_n * 12 + (8 << 20)
    return int(min(max(need, 32 << 20), _vmem_cap_bytes() * 7 // 10))


@functools.lru_cache(maxsize=None)
def _build_gather_call(NC, hw_in_pad, hw_out_pad, tile_n, tk, fill):
    fn = pl.pallas_call(
        partial(_gather_kernel, tk=tk, fill=float(fill)),
        out_shape=jax.ShapeDtypeStruct((NC, hw_out_pad), jnp.bfloat16),
        grid=(hw_out_pad // tile_n, hw_in_pad // tk),
        in_specs=[pl.BlockSpec((1, tile_n), lambda t, k: (0, t)),
                  pl.BlockSpec((NC, tk), lambda t, k: (0, k))],
        out_specs=pl.BlockSpec((NC, tile_n), lambda t, k: (0, t)),
        scratch_shapes=[pltpu.VMEM((NC, tile_n), jnp.float32)],
        compiler_params=pltpu.CompilerParams(
            dimension_semantics=("parallel", "arbitrary"),
            vmem_limit_bytes=_gather_vmem_limit(NC, tile_n, tk)),
    )
    return fn


@functools.lru_cache(maxsize=None)
def _build_geom_apply(N, C, H, W, use_floor, fill):
    HW = H * W
    NC = N * C
    tile_n, tk = _choose_gather_tiles(HW)
    hw_out_pad = _round_up(HW, tile_n)
    hw_in_pad = _round_up(HW, tk)
    gather = _build_gather_call(NC, hw_in_pad, hw_out_pad, tile_n, tk, float(fill))

    def apply(coeffs, img):
        # source-index table computed on device (no HW-sized host transfer)
        a00, a01, a02, a10, a11, a12 = (coeffs[i] for i in range(6))
        p = jnp.arange(hw_out_pad, dtype=jnp.float32)
        yy = jnp.floor(p / W)
        xx = p - yy * W
        sxf = a00 * xx + a01 * yy + a02
        syf = a10 * xx + a11 * yy + a12
        if use_floor:                        # nearest resize (interpolate 'nearest')
            sx, sy = jnp.floor(sxf), jnp.floor(syf)
        else:                                # grid_sample nearest (round half-to-even)
            sx, sy = jnp.rint(sxf), jnp.rint(syf)
        valid = ((sx >= 0) & (sx <= W - 1) & (sy >= 0) & (sy <= H - 1)
                 & (p < HW))
        flat = jnp.clip(sy, 0, H - 1) * W + jnp.clip(sx, 0, W - 1)
        src = jnp.where(valid, flat, -1.0).astype(jnp.int32).reshape(1, hw_out_pad)

        x = img.reshape(NC, HW)
        if hw_in_pad != HW:
            x = jnp.pad(x, ((0, 0), (0, hw_in_pad - HW)))
        out = gather(src, x)
        if hw_out_pad != HW:
            out = out[:, :HW]
        return out.reshape(N, C, H, W)

    return jax.jit(apply)


# -----------------------------------------------------------------------------
# torchvision-equivalent inverse affine matrix (absolute pixel coordinates)
# -----------------------------------------------------------------------------
def _inverse_affine_coeffs(W, H, angle, translate, scale, shear, center):
    if center is None:
        cx, cy = 0.0, 0.0
    else:
        cx = float(center[0]) - W * 0.5
        cy = float(center[1]) - H * 0.5
    rot = math.radians(angle)
    sx = math.radians(shear[0])
    sy = math.radians(shear[1])
    tx, ty = float(translate[0]), float(translate[1])
    a = math.cos(rot - sy) / math.cos(sy)
    b = -math.cos(rot - sy) * math.tan(sx) / math.cos(sy) - math.sin(rot)
    c = math.sin(rot - sy) / math.cos(sy)
    d = -math.sin(rot - sy) * math.tan(sx) / math.cos(sy) + math.cos(rot)
    m = [d / scale, -b / scale, 0.0, -c / scale, a / scale, 0.0]
    m[2] += m[0] * (-cx - tx) + m[1] * (-cy - ty)
    m[5] += m[3] * (-cx - tx) + m[4] * (-cy - ty)
    m[2] += cx
    m[5] += cy
    cw = (W - 1) * 0.5
    ch = (H - 1) * 0.5
    A02 = m[2] + cw - m[0] * cw - m[1] * ch
    A12 = m[5] + ch - m[3] * cw - m[4] * ch
    return (m[0], m[1], A02, m[3], m[4], A12)


# -----------------------------------------------------------------------------
# Equalize (XLA; chunked compare-histogram, no (HW, 256) temporary, no scatter)
# -----------------------------------------------------------------------------
@jax.jit
def _equalize_fn(img):
    # TODO(synk): a fully in-Pallas equalize needs an in-kernel histogram + LUT gather.
    x = img.astype(jnp.float32)
    N, C, H, W = x.shape
    NC = N * C
    flat = x.reshape(NC, H * W)
    bins = jnp.arange(256, dtype=jnp.float32)

    rows = x.reshape(NC, H, W).transpose(1, 0, 2)                 # (H, NC, W)

    def body(h_acc, row):                                          # row: (NC, W)
        oh = (row[:, :, None] == bins[None, None, :]).astype(jnp.float32)
        return h_acc + jnp.sum(oh, axis=1), None

    hist, _ = jax.lax.scan(body, jnp.zeros((NC, 256), jnp.float32), rows)

    total = jnp.float32(H * W)
    mx = jnp.max(flat, axis=1, keepdims=True)
    cnt_max = jnp.sum((flat == mx).astype(jnp.float32), axis=1, keepdims=True)
    step = jnp.floor((total - cnt_max) / 255.0)                    # (NC, 1)
    csum = jnp.cumsum(hist, axis=1)
    lut = jnp.floor((csum - hist + jnp.floor(step / 2.0)) / jnp.maximum(step, 1.0))
    lut = jnp.clip(lut, 0.0, 255.0)                                # (NC, 256)
    gathered = jnp.take_along_axis(lut, flat.astype(jnp.int32), axis=1)
    out = jnp.where(step == 0.0, flat, gathered)
    return out.reshape(N, C, H, W).astype(img.dtype)


# -----------------------------------------------------------------------------
# host-side crop-parameter sampling (mirrors get_resized_crop_params)
# -----------------------------------------------------------------------------
def _get_resized_crop_params(H, W, scale, ratio, rng):
    # NOTE: the reference does `height, width = F.get_image_size(img)` which returns
    # (width, height); identical for the square images used here.
    height, width = W, H
    area = float(height * width)
    log_ratio = np.log(np.asarray(ratio, dtype=np.float64))
    for _ in range(10):
        target_area = area * float(rng.uniform(scale[0], scale[1]))
        aspect_ratio = math.exp(float(rng.uniform(log_ratio[0], log_ratio[1])))
        w = int(round(math.sqrt(target_area * aspect_ratio)))
        h = int(round(math.sqrt(target_area / aspect_ratio)))
        if 0 < w <= width and 0 < h <= height:
            i = int(rng.integers(0, height - h + 1))
            j = int(rng.integers(0, width - w + 1))
            return i, j, h, w
    in_ratio = float(width) / float(height)
    if in_ratio < min(ratio):
        w = width
        h = int(round(w / min(ratio)))
    elif in_ratio > max(ratio):
        h = height
        w = int(round(h * max(ratio)))
    else:
        w = width
        h = height
    return (height - h) // 2, (width - w) // 2, h, w


# -----------------------------------------------------------------------------
# op dispatch; images are (N, C, H, W) bf16 (exact uint8 values)
# -----------------------------------------------------------------------------
def _apply_geometric(img, op_name, magnitude, fill, rng):
    N, C, H, W = img.shape
    use_floor = False
    if op_name == 'ShearX':
        coeffs = _inverse_affine_coeffs(W, H, 0.0, (0.0, 0.0), 1.0,
                                        (math.degrees(math.atan(magnitude)), 0.0),
                                        center=(0.0, 0.0))
    elif op_name == 'TranslateX':
        coeffs = _inverse_affine_coeffs(W, H, 0.0, (float(int(magnitude)), 0.0), 1.0,
                                        (0.0, 0.0), center=None)
    elif op_name == 'Rotate':
        coeffs = _inverse_affine_coeffs(W, H, -magnitude, (0.0, 0.0), 1.0,
                                        (0.0, 0.0), center=None)
    else:  # ResizedCrop
        i, j, h, w = _get_resized_crop_params(H, W, [1.0 - magnitude, 1.0],
                                              [3.0 / 4.0, 4.0 / 3.0], rng)
        coeffs = (w / W, 0.0, float(j), 0.0, h / H, float(i))
        use_floor = True
    apply = _build_geom_apply(N, C, H, W, use_floor, float(fill))
    return apply(jnp.asarray(coeffs, dtype=jnp.float32), img)


def _apply_op_pallas(img, op_name, magnitude, fill, rng):
    """Single-op dispatcher (used for tests / unfused paths)."""
    N, C, H, W = img.shape
    if op_name == 'Identity':
        return img
    if op_name in ('ShearX', 'TranslateX', 'Rotate', 'ResizedCrop'):
        return _apply_geometric(img, op_name, magnitude, fill, rng)
    if op_name == 'Equalize':
        return _equalize_fn(img)
    entry = _ew_entry(op_name, magnitude, C, H, W)
    return img if entry is None else _apply_ew_chain(img, (entry,))


# -----------------------------------------------------------------------------
# RandAugment (JAX / Pallas version)
# -----------------------------------------------------------------------------
class RandAugmentPallas:
    def __init__(self, num_ops=2, magnitude=9, num_magnitude_bins=31,
                 available_aug='Identity', fill=None, seed=0):
        self.num_ops = num_ops
        self.magnitude = magnitude
        self.num_magnitude_bins = num_magnitude_bins
        self.available_aug = available_aug   # parity with reference; unused in forward
        self.fill = fill
        self._rng = np.random.default_rng(seed)   # host RNG mirroring torch.randint/np.random

    def _augmentation_space(self, num_bins, image_size):
        return {
            'Identity': (None, False),
            'ShearX': (np.linspace(0.0, 0.3, num_bins), True),
            'TranslateX': (np.linspace(0.0, 150.0 / 331.0 * image_size[0], num_bins), True),
            'Rotate': (np.linspace(0.0, 30.0, num_bins), True),
            'Brightness': (np.linspace(0.0, 0.9, num_bins), True),
            'Color': (np.linspace(0.0, 0.9, num_bins), True),
            'Contrast': (np.linspace(0.0, 0.9, num_bins), True),
            'Sharpness': (np.linspace(0.0, 0.9, num_bins), True),
            'Posterize': (8 - np.round(np.arange(num_bins) / ((num_bins - 1) / 4)).astype(np.int32), False),
            'Solarize': (np.linspace(255.0, 0.0, num_bins), False),
            'AutoContrast': (None, False),
            'Equalize': (None, False),
            'Grayscale': (None, False),
            'ResizedCrop': (np.linspace(0.1, 0.9, num_bins), False),
        }

    def __call__(self, img_u8):
        # accepts (C, H, W) or (N, C, H, W); the sampled op sequence is applied to the
        # whole batch (matching torch semantics for batched tensor input).
        squeeze = (img_u8.ndim == 3)
        img4 = img_u8[None] if squeeze else img_u8
        N, C, H, W = img4.shape
        img = jnp.asarray(img4).astype(jnp.bfloat16)      # bf16 carry, exact for 0..255
        fill = 0.0 if self.fill is None else float(self.fill)

        pending = []                                       # fused elementwise run
        for _ in range(self.num_ops):
            space = self._augmentation_space(self.num_magnitude_bins, (W, H))
            op_index = int(self._rng.integers(0, len(space)))
            op_name = list(space.keys())[op_index]
            magnitudes, signed = space[op_name]
            mag_idx = int(self._rng.choice(np.arange(1, self.magnitude + 1)))
            magnitude = float(magnitudes[mag_idx]) if magnitudes is not None else 0.0
            if signed and int(self._rng.integers(0, 2)):
                magnitude *= -1.0

            if op_name == 'Identity':
                continue
            if op_name in _EW_OPS:
                entry = _ew_entry(op_name, magnitude, C, H, W)
                if entry is not None:
                    pending.append(entry)
                continue
            # geometric / equalize op: flush the fused elementwise chain first
            if pending:
                img = _apply_ew_chain(img, tuple(pending))
                pending = []
            if op_name == 'Equalize':
                img = _equalize_fn(img)
            else:
                img = _apply_geometric(img, op_name, magnitude, fill, self._rng)
        if pending:
            img = _apply_ew_chain(img, tuple(pending))

        out = img.astype(jnp.uint8)
        return out[0] if squeeze else out


if __name__ == "__main__":
    key = jax.random.PRNGKey(0)
    img = jax.random.randint(key, (2, 3, 16, 16), 0, 256, dtype=jnp.int32).astype(jnp.uint8)

    # smoke-test every op / kernel once with a fixed magnitude (batched path)
    rng = np.random.default_rng(1)
    img_b = jnp.asarray(img).astype(jnp.bfloat16)
    fixed_mags = {'Identity': 0.0, 'ShearX': 0.2, 'TranslateX': 3.0, 'Rotate': 20.0,
                  'Brightness': 0.5, 'Color': 0.5, 'Contrast': 0.5, 'Sharpness': 0.5,
                  'Posterize': 7.0, 'Solarize': 128.0, 'AutoContrast': 0.0,
                  'Equalize': 0.0, 'Grayscale': 0.0, 'ResizedCrop': 0.5}
    for name, mag in fixed_mags.items():
        out = jax.block_until_ready(_apply_op_pallas(img_b, name, mag, 0.0, rng))
        assert out.shape == img_b.shape

    # fused elementwise chain (one pallas_call for several photometric ops)
    chain_out = jax.block_until_ready(_apply_ew_chain(
        img_b, (('brightness', 1.5), ('sharpness', 1.5), ('autocontrast', 0.0))))
    assert chain_out.shape == img_b.shape

    # RandAugment forward (num_ops randomly-chosen sequential ops, like the reference)
    ra = RandAugmentPallas(num_ops=2, magnitude=9, num_magnitude_bins=31, seed=0)
    out = jax.block_until_ready(ra(img))
    assert out.shape == img.shape and out.dtype == jnp.uint8

    # single-image path
    out1 = jax.block_until_ready(ra(img[0]))
    assert out1.shape == img[0].shape and out1.dtype == jnp.uint8
    print("KERNEL_OK")
</pallas_src>

<mosaic_0001>
module attributes {stable_mosaic.version = 11 : i64} {
  func.func @_gather_kernel(%arg0: i32, %arg1: i32, %arg2: memref<1x256xi32, #tpu.memory_space<vmem>>, %arg3: memref<6x256xbf16, #tpu.memory_space<vmem>>, %arg4: memref<6x256xbf16, #tpu.memory_space<vmem>>, %arg5: memref<6x256xf32, #tpu.memory_space<vmem>>) attributes {dimension_semantics = [#tpu.dimension_semantics<parallel>, #tpu.dimension_semantics<arbitrary>], iteration_bounds = array<i64: 1, 1>, scalar_prefetch = 0 : i64, scratch_operands = 1 : i64, tpu.core_type = #tpu.core_type<tc>, window_params = [{transform_indices = @transform_0, window_bounds = array<i64: 1, 256>}, {transform_indices = @transform_1, window_bounds = array<i64: 6, 256>}, {transform_indices = @transform_2, window_bounds = array<i64: 6, 256>}]} {
    %c0_i32 = arith.constant 0 : i32
    %0 = arith.cmpi eq, %arg1, %c0_i32 : i32
    %1 = arith.extui %0 : i1 to i32
    %c0_i32_0 = arith.constant 0 : i32
    %2 = arith.cmpi ne, %1, %c0_i32_0 : i32
    scf.if %2 {
      %cst_10 = arith.constant 0.000000e+00 : f32
      %22 = vector.broadcast %cst_10 : f32 to vector<6x256xf32>
      %c0_11 = arith.constant 0 : index
      %c0_12 = arith.constant 0 : index
      %23 = vector.load %arg5[%c0_11, %c0_12] : memref<6x256xf32, #tpu.memory_space<vmem>>, vector<6x256xf32>
      tpu.vector_store %arg5[%c0_11, %c0_12], %22 {strides = array<i32>} : memref<6x256xf32, #tpu.memory_space<vmem>>, vector<6x256xf32>,
    } else {
    }
    %c0 = arith.constant 0 : index
    %c0_1 = arith.constant 0 : index
    %3 = vector.load %arg2[%c0, %c0_1] : memref<1x256xi32, #tpu.memory_space<vmem>>, vector<1x256xi32>
    %4 = tpu.iota {dimensions = array<i32: 0>} : vector<256x1xi32>
    %c256_i32 = arith.constant 256 : i32
    %5 = arith.muli %arg1, %c256_i32 : i32
    %6 = vector.broadcast %5 : i32 to vector<256x1xi32>
    %7 = arith.addi %4, %6 : vector<256x1xi32>
    %8 = vector.broadcast %7 : vector<256x1xi32> to vector<256x256xi32>
    %9 = vector.broadcast %3 : vector<1x256xi32> to vector<256x256xi32>
    %10 = arith.cmpi eq, %8, %9 : vector<256x256xi32>
    %11 = arith.extui %10 : vector<256x256xi1> to vector<256x256xi32>
    %12 = arith.sitofp %11 : vector<256x256xi32> to vector<256x256xf32>
    %13 = arith.truncf %12 : vector<256x256xf32> to vector<256x256xbf16>
    %c0_2 = arith.constant 0 : index
    %c0_3 = arith.constant 0 : index
    %14 = vector.load %arg5[%c0_2, %c0_3] : memref<6x256xf32, #tpu.memory_space<vmem>>, vector<6x256xf32>
    %c0_4 = arith.constant 0 : index
    %c0_5 = arith.constant 0 : index
    %15 = vector.load %arg3[%c0_4, %c0_5] : memref<6x256xbf16, #tpu.memory_space<vmem>>, vector<6x256xbf16>
    %cst = arith.constant dense<0.000000e+00> : vector<6x256xf32>
    %16 = tpu.matmul %15, %13, %cst {dimension_numbers = #tpu.dot_dimension_numbers<[1], [0], [0], [1], [0, 0, 1, 1], [], []>} : vector<6x256xbf16>, vector<256x256xbf16>, vector<6x256xf32> -> vector<6x256xf32>
    %17 = arith.addf %14, %16 : vector<6x256xf32>
    %c0_6 = arith.constant 0 : index
    %c0_7 = arith.constant 0 : index
    %18 = vector.load %arg5[%c0_6, %c0_7] : memref<6x256xf32, #tpu.memory_space<vmem>>, vector<6x256xf32>
    tpu.vector_store %arg5[%c0_6, %c0_7], %17 {strides = array<i32>} : memref<6x256xf32, #tpu.memory_space<vmem>>, vector<6x256xf32>,
    %c0_i32_8 = arith.constant 0 : i32
    %19 = arith.cmpi eq, %arg1, %c0_i32_8 : i32
    %20 = arith.extui %19 : i1 to i32
    %c0_i32_9 = arith.constant 0 : i32
    %21 = arith.cmpi ne, %20, %c0_i32_9 : i32
    scf.if %21 {
      %c0_i32_10 = arith.constant 0 : i32
      %22 = vector.broadcast %c0_i32_10 : i32 to vector<1x256xi32>
      %23 = arith.cmpi sge, %3, %22 : vector<1x256xi32>
      %c0_11 = arith.constant 0 : index
      %c0_12 = arith.constant 0 : index
      %24 = vector.load %arg5[%c0_11, %c0_12] : memref<6x256xf32, #tpu.memory_space<vmem>>, vector<6x256xf32>
      %cst_13 = arith.constant 0.000000e+00 : f32
      %25 = vector.shape_cast %23 : vector<1x256xi1> to vector<1x256xi1>
      %26 = vector.broadcast %25 : vector<1x256xi1> to vector<6x256xi1>
      %27 = vector.broadcast %cst_13 : f32 to vector<6x256xf32>
      %28 = arith.select %26, %24, %27 : vector<6x256xi1>, vector<6x256xf32>
      %29 = arith.truncf %28 : vector<6x256xf32> to vector<6x256xbf16>
      %c0_14 = arith.constant 0 : index
      %c0_15 = arith.constant 0 : index
      %30 = vector.load %arg4[%c0_14, %c0_15] : memref<6x256xbf16, #tpu.memory_space<vmem>>, vector<6x256xbf16>
      tpu.vector_store %arg4[%c0_14, %c0_15], %29 {strides = array<i32>} : memref<6x256xbf16, #tpu.memory_space<vmem>>, vector<6x256xbf16>,
    } else {
    }
    return
  }
  func.func @transform_0(%arg0: i32, %arg1: i32) -> (i32, i32) {
    %c0_i32 = arith.constant 0 : i32
    %c0_i32_0 = arith.constant 0 : i32
    return %c0_i32, %arg0 : i32, i32
  }
  func.func @transform_1(%arg0: i32, %arg1: i32) -> (i32, i32) {
    %c0_i32 = arith.constant 0 : i32
    %c0_i32_0 = arith.constant 0 : i32
    return %c0_i32, %arg1 : i32, i32
  }
  func.func @transform_2(%arg0: i32, %arg1: i32) -> (i32, i32) {
    %c0_i32 = arith.constant 0 : i32
    %c0_i32_0 = arith.constant 0 : i32
    return %c0_i32, %arg0 : i32, i32
  }
}

</mosaic_0001>

<bundles_post_ra>
// kernel: apply.1
= control target key start
LH: loop header
LB: loop body
LE: loop exit
PB: predicated region body
PF: predicated region fallthrough
CT: control target
= control target key end

     0   :  { %v18_v0 = vlaneseq  ;;  %v527_v13 = vmov 1.0|1.0   ;;  %v528_v42 = vmov 0.0   ;;  %v529_v53 = vmov 0   ;;  %s726_s0 = inlined_call_operand.vmem [shape: s32[1,256], index: 0, kind: input, shape index: {}]   ;;  %s727_s1 = inlined_call_operand.vmem [shape: bf16[6,256], index: 1, kind: input, shape index: {}]   ;;  %s728_s2 = inlined_call_operand.vmem [shape: bf16[6,256], index: 2, kind: output, shape index: {}]  }
   0x1   :  { %v548_v1 = vld [vmem:[%s726_s0] sm:$0x3]  ;;  %15 = vst [vmem:[#allocation2] sm:$0x3f] %v528_v42 }
   0x2   :  { %v550_v2 = vshrl.u32 %v18_v0, 7  ;;  %v553_v3 = vperm.slane %v548_v1, 0  ;;  %v556_v4 = vperm.slane %v548_v1, 1  ;;  %v313_v35 = vld [vmem:[%s727_s1] sm:$0x77] }
   0x3   :  { %v315_v38 = vunpack.c.l.b16 %v313_v35  ;;  %v316_v39 = vunpack.c.h.b16 %v313_v35  ;;  %16 = vst [vmem:[#allocation2 + $0x8] sm:$0x3f] %v528_v42 }
   0x4   :  { %v33_v5 = vadd.s32 112, %v550_v2  ;;  %v34_v6 = vadd.s32 120, %v550_v2  ;;  %v49_v7 = vadd.s32 240, %v550_v2  ;;  %v50_v8 = vadd.s32 248, %v550_v2 }
   0x5   :  { %v31_v9 = vadd.s32 96, %v550_v2  ;;  %v32_v10 = vadd.s32 104, %v550_v2  ;;  %v47_v11 = vadd.s32 224, %v550_v2  ;;  %v48_v12 = vadd.s32 232, %v550_v2 }
   0x6   :  { %vm115_vm0 = vcmp.eq.s32.totalorder %v33_v5, %v553_v3  ;;  %vm117_vm1 = vcmp.eq.s32.totalorder %v34_v6, %v553_v3  ;;  %vm147_vm2 = vcmp.eq.s32.totalorder %v49_v7, %v553_v3  ;;  %vm149_vm3 = vcmp.eq.s32.totalorder %v50_v8, %v553_v3 }
   0x7   :  { %vm460_vm4 = vmpackc.low %vm117_vm1, %vm115_vm0  ;;  %vm116_vm5 = vcmp.eq.s32.totalorder %v33_v5, %v556_v4  ;;  %vm118_vm6 = vcmp.eq.s32.totalorder %v34_v6, %v556_v4  ;;  %vm148_vm7 = vcmp.eq.s32.totalorder %v49_v7, %v556_v4  ;;  %vm150_vm8 = vcmp.eq.s32.totalorder %v50_v8, %v556_v4 }
   0x8   :  { %461 = vmatpush.bf16.msk.msra.mxu0 %vm460_vm4, %v527_v13  ;;  %vm476_vm9 = vmpackc.low %vm149_vm3, %vm147_vm2  ;;  %vm111_vm10 = vcmp.eq.s32.totalorder %v31_v9, %v553_v3  ;;  %vm113_vm11 = vcmp.eq.s32.totalorder %v32_v10, %v553_v3  ;;  %vm143_vm13 = vcmp.eq.s32.totalorder %v47_v11, %v553_v3  ;;  %vm145_vm14 = vcmp.eq.s32.totalorder %v48_v12, %v553_v3  ;;  %v311_v44 = vld [vmem:[#allocation2] sm:$0x3f] }
   0x9   :  { %477 = vmatpush.bf16.msk.msra.mxu1 %vm476_vm9, %v527_v13  ;;  %vm492_vm12 = vmpackc.low %vm118_vm6, %vm116_vm5  ;;  %vm112_vm15 = vcmp.eq.s32.totalorder %v31_v9, %v556_v4  ;;  %vm114_vm0 = vcmp.eq.s32.totalorder %v32_v10, %v556_v4  ;;  %v29_v14 = vadd.s32 80, %v550_v2  ;;  %v30_v15 = vadd.s32 88, %v550_v2 }
   0xa   :  { %493 = vmatpush.bf16.msk.msra.mxu2 %vm492_vm12, %v527_v13  ;;  %vm508_vm1 = vmpackc.low %vm150_vm8, %vm148_vm7  ;;  %v45_v16 = vadd.s32 208, %v550_v2  ;;  %v46_v17 = vadd.s32 216, %v550_v2  ;;  %vm144_vm3 = vcmp.eq.s32.totalorder %v47_v11, %v556_v4  ;;  %vm146_vm4 = vcmp.eq.s32.totalorder %v48_v12, %v556_v4  ;;  %v312_v50 = vld [vmem:[#allocation2 + $0x8] sm:$0x3f] }
   0xb   :  { %509 = vmatpush.bf16.msk.msra.mxu3 %vm508_vm1, %v527_v13  ;;  %vm462_vm2 = vmpackc.low %vm113_vm11, %vm111_vm10  ;;  %vm107_vm6 = vcmp.eq.s32.totalorder %v29_v14, %v553_v3  ;;  %vm109_vm7 = vcmp.eq.s32.totalorder %v30_v15, %v553_v3  ;;  %v27_v18 = vadd.s32 64, %v550_v2  ;;  %v28_v19 = vadd.s32 72, %v550_v2 }
   0xc   :  { %463 = vmatpush.bf16.msk.msra.mxu0 %vm462_vm2, %v527_v13  ;;  %vm478_vm5 = vmpackc.low %vm145_vm14, %vm143_vm13  ;;  %vm139_vm9 = vcmp.eq.s32.totalorder %v45_v16, %v553_v3  ;;  %vm141_vm10 = vcmp.eq.s32.totalorder %v46_v17, %v553_v3  ;;  %v43_v20 = vadd.s32 192, %v550_v2  ;;  %v44_v21 = vadd.s32 200, %v550_v2 }
   0xd   :  { %479 = vmatpush.bf16.msk.msra.mxu1 %vm478_vm5, %v527_v13  ;;  %vm494_vm8 = vmpackc.low %vm114_vm0, %vm112_vm15  ;;  %vm108_vm12 = vcmp.eq.s32.totalorder %v29_v14, %v556_v4  ;;  %vm110_vm13 = vcmp.eq.s32.totalorder %v30_v15, %v556_v4  ;;  %vm140_vm15 = vcmp.eq.s32.totalorder %v45_v16, %v556_v4  ;;  %vm142_vm0 = vcmp.eq.s32.totalorder %v46_v17, %v556_v4 }
   0xe   :  { %495 = vmatpush.bf16.msk.msra.mxu2 %vm494_vm8, %v527_v13  ;;  %vm510_vm11 = vmpackc.low %vm146_vm4, %vm144_vm3  ;;  %vm103_vm2 = vcmp.eq.s32.totalorder %v27_v18, %v553_v3  ;;  %vm105_vm3 = vcmp.eq.s32.totalorder %v28_v19, %v553_v3  ;;  %v25_v22 = vadd.s32 48, %v550_v2  ;;  %v26_v23 = vadd.s32 56, %v550_v2 }
   0xf   :  { %511 = vmatpush.bf16.msk.msra.mxu3 %vm510_vm11, %v527_v13  ;;  %vm464_vm14 = vmpackc.low %vm109_vm7, %vm107_vm6  ;;  %vm135_vm5 = vcmp.eq.s32.totalorder %v43_v20, %v553_v3  ;;  %vm137_vm6 = vcmp.eq.s32.totalorder %v44_v21, %v553_v3  ;;  %v41_v24 = vadd.s32 176, %v550_v2  ;;  %v42_v25 = vadd.s32 184, %v550_v2 }
  0x10   :  { %465 = vmatpush.bf16.msk.msra.mxu0 %vm464_vm14, %v527_v13  ;;  %vm480_vm1 = vmpackc.low %vm141_vm10, %vm139_vm9  ;;  %vm104_vm8 = vcmp.eq.s32.totalorder %v27_v18, %v556_v4  ;;  %vm106_vm9 = vcmp.eq.s32.totalorder %v28_v19, %v556_v4  ;;  %vm136_vm11 = vcmp.eq.s32.totalorder %v43_v20, %v556_v4  ;;  %vm99_vm14 = vcmp.eq.s32.totalorder %v25_v22, %v553_v3 }
  0x11   :  { %481 = vmatpush.bf16.msk.msra.mxu1 %vm480_vm1, %v527_v13  ;;  %vm496_vm4 = vmpackc.low %vm110_vm13, %vm108_vm12  ;;  %vm138_vm12 = vcmp.eq.s32.totalorder %v44_v21, %v556_v4  ;;  %v23_v26 = vadd.s32 32, %v550_v2  ;;  %v24_v27 = vadd.s32 40, %v550_v2  ;;  %vm131_vm1 = vcmp.eq.s32.totalorder %v41_v24, %v553_v3 }
  0x12   :  { %497 = vmatpush.bf16.msk.msra.mxu2 %vm496_vm4, %v527_v13  ;;  %vm512_vm7 = vmpackc.low %vm142_vm0, %vm140_vm15  ;;  %vm101_vm15 = vcmp.eq.s32.totalorder %v26_v23, %v553_v3  ;;  %v39_v28 = vadd.s32 160, %v550_v2  ;;  %v40_v29 = vadd.s32 168, %v550_v2  ;;  %vm100_vm4 = vcmp.eq.s32.totalorder %v25_v22, %v556_v4 }
  0x13   :  { %513 = vmatpush.bf16.msk.msra.mxu3 %vm512_vm7, %v527_v13  ;;  %vm466_vm10 = vmpackc.low %vm105_vm3, %vm103_vm2  ;;  %vm133_vm2 = vcmp.eq.s32.totalorder %v42_v25, %v553_v3  ;;  %vm132_vm7 = vcmp.eq.s32.totalorder %v41_v24, %v556_v4  ;;  %v21_v30 = vadd.s32 16, %v550_v2  ;;  %v22_v31 = vadd.s32 24, %v550_v2 }
  0x14   :  { %467 = vmatpush.bf16.msk.msra.mxu0 %vm466_vm10, %v527_v13  ;;  %vm482_vm13 = vmpackc.low %vm137_vm6, %vm135_vm5  ;;  %vm102_vm5 = vcmp.eq.s32.totalorder %v26_v23, %v556_v4  ;;  %vm95_vm10 = vcmp.eq.s32.totalorder %v23_v26, %v553_v3  ;;  %v37_v32 = vadd.s32 144, %v550_v2  ;;  %v38_v33 = vadd.s32 152, %v550_v2 }
  0x15   :  { %483 = vmatpush.bf16.msk.msra.mxu1 %vm482_vm13, %v527_v13  ;;  %vm498_vm0 = vmpackc.low %vm106_vm9, %vm104_vm8  ;;  %vm134_vm8 = vcmp.eq.s32.totalorder %v42_v25, %v556_v4  ;;  %vm127_vm13 = vcmp.eq.s32.totalorder %v39_v28, %v553_v3  ;;  %v20_v34 = vadd.s32 8, %v550_v2  ;;  %v35_v36 = vadd.s32 128, %v550_v2 }
  0x16   :  { %499 = vmatpush.bf16.msk.msra.mxu2 %vm498_vm0, %v527_v13  ;;  %vm514_vm3 = vmpackc.low %vm138_vm12, %vm136_vm11  ;;  %vm97_vm11 = vcmp.eq.s32.totalorder %v24_v27, %v553_v3  ;;  %vm96_vm0 = vcmp.eq.s32.totalorder %v23_v26, %v556_v4  ;;  %v36_v37 = vadd.s32 136, %v550_v2  ;;  %v317_v40 = vpack.c.b16 %v315_v38, %v315_v38 }
  0x17   :  { %515 = vmatpush.bf16.msk.msra.mxu3 %vm514_vm3, %v527_v13  ;;  %vm468_vm6 = vmpackc.low %vm101_vm15, %vm99_vm14  ;;  %vm129_vm14 = vcmp.eq.s32.totalorder %v40_v29, %v553_v3  ;;  %vm128_vm3 = vcmp.eq.s32.totalorder %v39_v28, %v556_v4  ;;  %v318_v41 = vpack.c.b16 %v316_v39, %v316_v39 }
  0x18   :  { %469 = vmatpush.bf16.msk.msra.mxu0 %vm468_vm6, %v527_v13  ;;  %vm484_vm9 = vmpackc.low %vm133_vm2, %vm131_vm1  ;;  %vm98_vm1 = vcmp.eq.s32.totalorder %v24_v27, %v556_v4  ;;  %vm91_vm6 = vcmp.eq.s32.totalorder %v21_v30, %v553_v3 }
  0x19   :  { %485 = vmatpush.bf16.msk.msra.mxu1 %vm484_vm9, %v527_v13  ;;  %vm500_vm12 = vmpackc.low %vm102_vm5, %vm100_vm4  ;;  %vm130_vm4 = vcmp.eq.s32.totalorder %v40_v29, %v556_v4  ;;  %vm123_vm9 = vcmp.eq.s32.totalorder %v37_v32, %v553_v3 }
  0x1a   :  { %501 = vmatpush.bf16.msk.msra.mxu2 %vm500_vm12, %v527_v13  ;;  %vm516_vm15 = vmpackc.low %vm134_vm8, %vm132_vm7  ;;  %vm93_vm7 = vcmp.eq.s32.totalorder %v22_v31, %v553_v3  ;;  %vm92_vm12 = vcmp.eq.s32.totalorder %v21_v30, %v556_v4 }
  0x1b   :  { %517 = vmatpush.bf16.msk.msra.mxu3 %vm516_vm15, %v527_v13  ;;  %vm470_vm2 = vmpackc.low %vm97_vm11, %vm95_vm10  ;;  %vm125_vm10 = vcmp.eq.s32.totalorder %v38_v33, %v553_v3  ;;  %vm124_vm15 = vcmp.eq.s32.totalorder %v37_v32, %v556_v4 }
  0x1c   :  { %471 = vmatpush.bf16.msk.msra.mxu0 %vm470_vm2, %v527_v13  ;;  %vm486_vm5 = vmpackc.low %vm129_vm14, %vm127_vm13  ;;  %vm94_vm13 = vcmp.eq.s32.totalorder %v22_v31, %v556_v4  ;;  %vm87_vm2 = vcmp.eq.s32.totalorder %v550_v2, %v553_v3 }
  0x1d   :  { %487 = vmatpush.bf16.msk.msra.mxu1 %vm486_vm5, %v527_v13  ;;  %vm502_vm8 = vmpackc.low %vm98_vm1, %vm96_vm0  ;;  %vm126_vm0 = vcmp.eq.s32.totalorder %v38_v33, %v556_v4  ;;  %vm119_vm5 = vcmp.eq.s32.totalorder %v35_v36, %v553_v3 }
  0x1e   :  { %503 = vmatpush.bf16.msk.msra.mxu2 %vm502_vm8, %v527_v13  ;;  %vm518_vm11 = vmpackc.low %vm130_vm4, %vm128_vm3  ;;  %vm89_vm3 = vcmp.eq.s32.totalorder %v20_v34, %v553_v3  ;;  %vm88_vm8 = vcmp.eq.s32.totalorder %v550_v2, %v556_v4 }
  0x1f   :  { %519 = vmatpush.bf16.msk.msra.mxu3 %vm518_vm11, %v527_v13  ;;  %vm472_vm14 = vmpackc.low %vm93_vm7, %vm91_vm6  ;;  %vm121_vm6 = vcmp.eq.s32.totalorder %v36_v37, %v553_v3  ;;  %vm120_vm11 = vcmp.eq.s32.totalorder %v35_v36, %v556_v4 }
  0x20   :  { %473 = vmatpush.bf16.msk.msra.mxu0 %vm472_vm14, %v527_v13  ;;  %vm488_vm1 = vmpackc.low %vm125_vm10, %vm123_vm9  ;;  %vm90_vm9 = vcmp.eq.s32.totalorder %v20_v34, %v556_v4  ;;  %vm122_vm14 = vcmp.eq.s32.totalorder %v36_v37, %v556_v4 }
  0x21   :  { %489 = vmatpush.bf16.msk.msra.mxu1 %vm488_vm1, %v527_v13  ;;  %vm504_vm4 = vmpackc.low %vm94_vm13, %vm92_vm12 }
  0x22   :  { %505 = vmatpush.bf16.msk.msra.mxu2 %vm504_vm4, %v527_v13  ;;  %vm520_vm7 = vmpackc.low %vm126_vm0, %vm124_vm15  ;;  %vm380_vm0 = vcmp.ge.s32.totalorder %v548_v1, 0 }
  0x23   :  { %521 = vmatpush.bf16.msk.msra.mxu3 %vm520_vm7, %v527_v13  ;;  %vm474_vm10 = vmpackc.low %vm89_vm3, %vm87_vm2  ;;  %v383_v54 = vsel %vm380_vm0, 1, %v529_v53 }
  0x24   :  { %475 = vmatpush.bf16.msk.msra.mxu0 %vm474_vm10, %v527_v13  ;;  %vm490_vm12 = vmpackc.low %vm121_vm6, %vm119_vm5  ;;  %v384_v57 = vperm.slane %v383_v54, 0  ;;  %v385_v58 = vperm.slane %v383_v54, 1 }
  0x25   :  { %491 = vmatpush.bf16.msk.msra.mxu1 %vm490_vm12, %v527_v13  ;;  %vm506_vm13 = vmpackc.low %vm90_vm9, %vm88_vm8 }
  0x26   :  { %507 = vmatpush.bf16.msk.msra.mxu2 %vm506_vm13, %v527_v13  ;;  %vm522_vm15 = vmpackc.low %vm122_vm14, %vm120_vm11  ;;  %vm386_vm1 = vcmp.eq.s32.totalorder %v384_v57, 1  ;;  %vm387_vm2 = vcmp.eq.s32.totalorder %v385_v58, 1 }
  0x27   :  { %523 = vmatpush.bf16.msk.msra.mxu3 %vm522_vm15, %v527_v13  ;;  %329 = vmatmul.bf16.vlgmr.msra.gmra.mxu0 %v317_v40 }
  0x28   :  { %342 = vmatmul.bf16.vlgmr.msra.gmra.mxu1 %v318_v41 }
  0x29   :  { %355 = vmatmul.bf16.vlgmr.msra.gmra.mxu2 %v317_v40 }
  0x2a   :  { %368 = vmatmul.bf16.vlgmr.msra.gmra.mxu3 %v318_v41 }
  0xa4   :  { %v330_v43 = vpop.f32.mrf.mxu0 }
  0xa5   :  { %v343_v45 = vpop.f32.mrf.mxu1 }
  0xa6   :  { %v344_v46 = vadd.f32 %v343_v45, %v330_v43 }
  0xa8   :  { %v373_v47 = vadd.f32 %v344_v46, %v311_v44 }
  0xaa   :  { %375 = vst [vmem:[#allocation2] sm:$0x3f] %v373_v47 }
  0xac   :  { %v356_v48 = vpop.f32.mrf.mxu2  ;;  %v332_v49 = vpop.f32.mrf.mxu0 }
  0xad   :  { %v369_v51 = vpop.f32.mrf.mxu3  ;;  %v345_v52 = vpop.f32.mrf.mxu1 }
  0xae   :  { %v370_v55 = vadd.f32 %v369_v51, %v356_v48 }
  0xb0   :  { %v374_v56 = vadd.f32 %v370_v55, %v312_v50 }
  0xb1   :  { %v381_v60 = vld [vmem:[#allocation2] sm:$0x3f] }
  0xb2   :  { %376 = vst [vmem:[#allocation2 + $0x8] sm:$0x3f] %v374_v56  ;;  %v388_v62 = vsel %vm386_vm1, %v381_v60, 0.0 }
  0xb4   :  { %v358_v59 = vpop.f32.mrf.mxu2 }
  0xb5   :  { %v371_v61 = vpop.f32.mrf.mxu3 }
  0xb9   :  { %v382_v63 = vld [vmem:[#allocation2 + $0x8] sm:$0x3f] }
  0xba   :  { %v389_v0 = vsel %vm387_vm2, %v382_v63, 0.0 }
  0xbb   :  { %v390_v1 = vpack.c.bf16 %v389_v0, %v388_v62 }
  0xbd   :  { %391 = vst [vmem:[%s728_s2] sm:$0x77] %v390_v1 }

</bundles_post_ra>
